<compile_context>
chip_gen: v7x
topology: tpu7x:2x2x1
jax: 0.10.0
libtpu: 0.0.40
codegen_flags: <defaults>
</compile_context>

<pallas_src>
import jax
import jax.numpy as jnp
from jax.experimental import pallas as pl
from jax.experimental.pallas import tpu as pltpu


LANE = 128                      # output columns padded to the 128-wide lane dim
SUBLANE = 8                     # batch tiles aligned to the 8-deep sublane dim
MXU_M = 256                     # MXU M-granularity on v6e/v7x
MAX_TILE_B = 2048               # per-step batch tile cap
VMEM_LIMIT_BYTES = 32 * 1024 * 1024    # explicit scoped-VMEM limit (safe v5e..v7x)
VMEM_TILE_BUDGET = 24 * 1024 * 1024    # budget used when sizing the batch tile


def _round_up(x, m):
    return m * ((x + m - 1) // m)


def actor_kernel(obs_ref, w1_ref, b1_ref, w2_ref, b2_ref, w3_ref, b3_ref, out_ref):
    """One batch tile of Linear->ReLU->Linear->ReLU->Linear->Softmax."""
    # MXU matmuls in bf16 with f32 accumulation; epilogue stays f32
    # (v5e VPU/EUP have no bf16 path).
    x = obs_ref[...].astype(jnp.bfloat16)

    h1 = jnp.dot(x, w1_ref[...], preferred_element_type=jnp.float32) + b1_ref[...]
    h1 = jnp.maximum(h1, 0.0)

    h2 = jnp.dot(h1.astype(jnp.bfloat16), w2_ref[...],
                 preferred_element_type=jnp.float32) + b2_ref[...]
    h2 = jnp.maximum(h2, 0.0)

    # Lane-padded final layer: pad columns of w3 are 0, pad columns of b3 are
    # -1e30, so the padded logits contribute exactly 0 to the softmax sum.
    logits = jnp.dot(h2.astype(jnp.bfloat16), w3_ref[...],
                     preferred_element_type=jnp.float32) + b3_ref[...]

    m = jnp.max(logits, axis=-1, keepdims=True)
    e = jnp.exp(logits - m)
    denom = jnp.sum(e, axis=-1, keepdims=True)
    # Exact divide: the VALU has slack in this MXU-bound kernel, and this
    # matches PyTorch softmax normalization exactly (rows sum to 1).
    out_ref[...] = (e / denom).astype(out_ref.dtype)


def _choose_tiling(B, obs_dim, hidden, out_pad):
    """Pick (tile_b, num_tiles) for the 1-D batch grid.

    - Balanced tiles (padding < one alignment unit per tile), never padding B
      up to a multiple of the max tile.
    - >= 2 (and an even number of) tiles whenever the batch is large enough,
      so both v7x TensorCores get work under dimension_semantics="parallel".
    - MXU M-alignment (256) applied only when it costs little extra padding.
    - Tile additionally capped by a conservative per-row VMEM estimate.
    """
    b_sub = _round_up(B, SUBLANE)

    # Conservative per-row VMEM bytes: double-buffered obs/out tiles plus the
    # f32 (and bf16-cast) activation intermediates.
    row_bytes = (2 * 4 * obs_dim + 2 * obs_dim      # obs f32 x2 buffers + bf16 copy
                 + 2 * 4 * out_pad                  # out f32 x2 buffers
                 + 2 * (4 + 2) * hidden             # h1, h2 in f32 + bf16 copies
                 + 3 * 4 * out_pad)                 # logits / exp / probs in f32
    vmem_cap = max(SUBLANE, (VMEM_TILE_BUDGET // row_bytes) // SUBLANE * SUBLANE)
    max_tile = min(MAX_TILE_B, vmem_cap)

    num_tiles = pl.cdiv(b_sub, max_tile)
    if num_tiles < 2 and b_sub >= 2 * MXU_M:
        num_tiles = 2                       # ensure both v7x TCs have work
    if num_tiles > 1 and num_tiles % 2:
        num_tiles += 1                      # even step count: no core imbalance

    tile_b = _round_up(pl.cdiv(b_sub, num_tiles), SUBLANE)

    # MXU M-alignment, only when the extra padding is small (<= tile_b/8).
    tile_mxu = _round_up(tile_b, MXU_M)
    if tile_b >= MXU_M and (tile_mxu - tile_b) <= tile_b // 8:
        tile_b = tile_mxu

    return tile_b, num_tiles


def actor_forward(obs, params):
    """obs: [B, obs_dim] float32 -> [B, act_dim] softmax probabilities (f32)."""
    B, obs_dim = obs.shape
    act_dim = params["act_dim"]
    w1, b1 = params["w1"], params["b1"]
    w2, b2 = params["w2"], params["b2"]
    w3, b3 = params["w3"], params["b3"]
    hidden = w1.shape[1]
    out_pad = w3.shape[1]  # lane-padded act_dim (multiple of 128)

    tile_b, num_tiles = _choose_tiling(B, obs_dim, hidden, out_pad)
    b_pad = tile_b * num_tiles
    if b_pad != B:
        obs = jnp.pad(obs, ((0, b_pad - B), (0, 0)))

    # Weights/biases: constant block index -> DMA'd once and VMEM-resident
    # across all batch-grid steps. obs/out: tiled along batch, double-buffered.
    def resident(a):
        return pl.BlockSpec(a.shape, lambda i: (0,) * a.ndim)

    in_specs = [
        pl.BlockSpec((tile_b, obs_dim), lambda i: (i, 0)),
        resident(w1), resident(b1),
        resident(w2), resident(b2),
        resident(w3), resident(b3),
    ]
    out_specs = pl.BlockSpec((tile_b, out_pad), lambda i: (i, 0))

    weight_bytes = sum(int(a.size) * a.dtype.itemsize
                       for a in (w1, b1, w2, b2, w3, b3))
    cost = pl.CostEstimate(
        flops=2 * b_pad * (obs_dim * hidden + hidden * hidden + hidden * out_pad),
        transcendentals=b_pad * out_pad,  # exp
        bytes_accessed=int(obs.size) * obs.dtype.itemsize
                       + b_pad * out_pad * 4
                       + weight_bytes,
    )

    out = pl.pallas_call(
        actor_kernel,
        out_shape=jax.ShapeDtypeStruct((b_pad, out_pad), jnp.float32),
        grid=(num_tiles,),
        in_specs=in_specs,
        out_specs=out_specs,
        compiler_params=pltpu.CompilerParams(
            # Batch axis is embarrassingly parallel -> megacore-shard on v7x.
            dimension_semantics=("parallel",),
            # Large tiles still fit v5e's smaller scoped-VMEM default.
            vmem_limit_bytes=VMEM_LIMIT_BYTES,
        ),
        cost_estimate=cost,
    )(obs, w1, b1, w2, b2, w3, b3)

    # Slice away batch padding and the lane padding of the action dim.
    return out[:B, :act_dim]


def init_actor_params(key, obs_dim, act_dim, hidden=256):
    """PyTorch nn.Linear-style init (uniform +/- 1/sqrt(fan_in)).

    Weights stored [in, out] in bf16 (MXU-native); biases f32. The last layer
    is lane-padded to a multiple of 128 columns: w3 pad columns are 0 and b3
    pad columns are -1e30 (f32, so no overflow) so padded logits vanish under
    softmax.
    """
    def linear(k, fan_in, fan_out):
        kw, kb = jax.random.split(k)
        bound = 1.0 / jnp.sqrt(jnp.float32(fan_in))
        w = jax.random.uniform(kw, (fan_in, fan_out), jnp.float32, -bound, bound)
        b = jax.random.uniform(kb, (1, fan_out), jnp.float32, -bound, bound)
        return w, b

    k1, k2, k3 = jax.random.split(key, 3)
    w1, b1 = linear(k1, obs_dim, hidden)
    w2, b2 = linear(k2, hidden, hidden)
    w3, b3 = linear(k3, hidden, act_dim)

    out_pad = _round_up(act_dim, LANE)
    w3 = jnp.pad(w3, ((0, 0), (0, out_pad - act_dim)))
    b3 = jnp.pad(b3, ((0, 0), (0, out_pad - act_dim)), constant_values=-1e30)

    return {
        "w1": w1.astype(jnp.bfloat16), "b1": b1,
        "w2": w2.astype(jnp.bfloat16), "b2": b2,
        "w3": w3.astype(jnp.bfloat16), "b3": b3,
        "act_dim": act_dim,
    }


def _reference_forward(obs, params):
    """Pure-JAX reference with the same bf16 weight/activation casts."""
    x = obs.astype(jnp.bfloat16)
    h1 = jnp.maximum(
        jnp.dot(x, params["w1"], preferred_element_type=jnp.float32) + params["b1"], 0.0)
    h2 = jnp.maximum(
        jnp.dot(h1.astype(jnp.bfloat16), params["w2"],
                preferred_element_type=jnp.float32) + params["b2"], 0.0)
    logits = (jnp.dot(h2.astype(jnp.bfloat16), params["w3"],
                      preferred_element_type=jnp.float32) + params["b3"])
    return jax.nn.softmax(logits, axis=-1)[:, :params["act_dim"]]


if __name__ == "__main__":
    key = jax.random.PRNGKey(0)
    k_params, k_obs = jax.random.split(key)

    B, OBS_DIM, ACT_DIM = 2, 16, 8
    params = init_actor_params(k_params, OBS_DIM, ACT_DIM)
    obs = jax.random.normal(k_obs, (B, OBS_DIM), dtype=jnp.float32)

    out = actor_forward(obs, params)
    out = jax.block_until_ready(out)

    ref = _reference_forward(obs, params)

    # sanity: correct shape, valid probability rows, matches bf16 reference
    assert out.shape == (B, ACT_DIM)
    assert bool(jnp.all(out >= 0.0))
    assert bool(jnp.allclose(jnp.sum(out, axis=-1), 1.0, atol=1e-5))
    assert bool(jnp.allclose(out, ref, atol=5e-3, rtol=5e-3))

    print("KERNEL_OK")
</pallas_src>

<mosaic_0001>
module attributes {stable_mosaic.version = 11 : i64} {
  func.func @actor_kernel(%arg0: i32, %arg1: memref<8x16xf32, #tpu.memory_space<vmem>>, %arg2: memref<16x256xbf16, #tpu.memory_space<vmem>>, %arg3: memref<1x256xf32, #tpu.memory_space<vmem>>, %arg4: memref<256x256xbf16, #tpu.memory_space<vmem>>, %arg5: memref<1x256xf32, #tpu.memory_space<vmem>>, %arg6: memref<256x128xbf16, #tpu.memory_space<vmem>>, %arg7: memref<1x128xf32, #tpu.memory_space<vmem>>, %arg8: memref<8x128xf32, #tpu.memory_space<vmem>>) attributes {dimension_semantics = [#tpu.dimension_semantics<parallel>], iteration_bounds = array<i64: 1>, scalar_prefetch = 0 : i64, scratch_operands = 0 : i64, tpu.core_type = #tpu.core_type<tc>, window_params = [{transform_indices = @transform_0, window_bounds = array<i64: 8, 16>}, {pipeline_mode = #tpu.pipeline_mode<synchronous>, transform_indices = @transform_1, window_bounds = array<i64: 16, 256>}, {pipeline_mode = #tpu.pipeline_mode<synchronous>, transform_indices = @transform_2, window_bounds = array<i64: 1, 256>}, {pipeline_mode = #tpu.pipeline_mode<synchronous>, transform_indices = @transform_3, window_bounds = array<i64: 256, 256>}, {pipeline_mode = #tpu.pipeline_mode<synchronous>, transform_indices = @transform_4, window_bounds = array<i64: 1, 256>}, {pipeline_mode = #tpu.pipeline_mode<synchronous>, transform_indices = @transform_5, window_bounds = array<i64: 256, 128>}, {pipeline_mode = #tpu.pipeline_mode<synchronous>, transform_indices = @transform_6, window_bounds = array<i64: 1, 128>}, {transform_indices = @transform_7, window_bounds = array<i64: 8, 128>}]} {
    %c0 = arith.constant 0 : index
    %c0_0 = arith.constant 0 : index
    %0 = vector.load %arg1[%c0, %c0_0] : memref<8x16xf32, #tpu.memory_space<vmem>>, vector<8x16xf32>
    %1 = arith.truncf %0 : vector<8x16xf32> to vector<8x16xbf16>
    %c0_1 = arith.constant 0 : index
    %c0_2 = arith.constant 0 : index
    %2 = vector.load %arg2[%c0_1, %c0_2] : memref<16x256xbf16, #tpu.memory_space<vmem>>, vector<16x256xbf16>
    %cst = arith.constant dense<0.000000e+00> : vector<8x256xf32>
    %3 = tpu.matmul %1, %2, %cst {dimension_numbers = #tpu.dot_dimension_numbers<[1], [0], [0], [1], [0, 0, 1, 1], [], []>} : vector<8x16xbf16>, vector<16x256xbf16>, vector<8x256xf32> -> vector<8x256xf32>
    %c0_3 = arith.constant 0 : index
    %c0_4 = arith.constant 0 : index
    %4 = vector.load %arg3[%c0_3, %c0_4] : memref<1x256xf32, #tpu.memory_space<vmem>>, vector<1x256xf32>
    %5 = vector.broadcast %4 : vector<1x256xf32> to vector<8x256xf32>
    %6 = arith.addf %3, %5 : vector<8x256xf32>
    %cst_5 = arith.constant 0.000000e+00 : f32
    %7 = vector.broadcast %cst_5 : f32 to vector<8x256xf32>
    %8 = arith.maximumf %6, %7 : vector<8x256xf32>
    %9 = arith.truncf %8 : vector<8x256xf32> to vector<8x256xbf16>
    %c0_6 = arith.constant 0 : index
    %c0_7 = arith.constant 0 : index
    %10 = vector.load %arg4[%c0_6, %c0_7] : memref<256x256xbf16, #tpu.memory_space<vmem>>, vector<256x256xbf16>
    %cst_8 = arith.constant dense<0.000000e+00> : vector<8x256xf32>
    %11 = tpu.matmul %9, %10, %cst_8 {dimension_numbers = #tpu.dot_dimension_numbers<[1], [0], [0], [1], [0, 0, 1, 1], [], []>} : vector<8x256xbf16>, vector<256x256xbf16>, vector<8x256xf32> -> vector<8x256xf32>
    %c0_9 = arith.constant 0 : index
    %c0_10 = arith.constant 0 : index
    %12 = vector.load %arg5[%c0_9, %c0_10] : memref<1x256xf32, #tpu.memory_space<vmem>>, vector<1x256xf32>
    %13 = vector.broadcast %12 : vector<1x256xf32> to vector<8x256xf32>
    %14 = arith.addf %11, %13 : vector<8x256xf32>
    %cst_11 = arith.constant 0.000000e+00 : f32
    %15 = vector.broadcast %cst_11 : f32 to vector<8x256xf32>
    %16 = arith.maximumf %14, %15 : vector<8x256xf32>
    %17 = arith.truncf %16 : vector<8x256xf32> to vector<8x256xbf16>
    %c0_12 = arith.constant 0 : index
    %c0_13 = arith.constant 0 : index
    %18 = vector.load %arg6[%c0_12, %c0_13] : memref<256x128xbf16, #tpu.memory_space<vmem>>, vector<256x128xbf16>
    %cst_14 = arith.constant dense<0.000000e+00> : vector<8x128xf32>
    %19 = tpu.matmul %17, %18, %cst_14 {dimension_numbers = #tpu.dot_dimension_numbers<[1], [0], [0], [1], [0, 0, 1, 1], [], []>} : vector<8x256xbf16>, vector<256x128xbf16>, vector<8x128xf32> -> vector<8x128xf32>
    %c0_15 = arith.constant 0 : index
    %c0_16 = arith.constant 0 : index
    %20 = vector.load %arg7[%c0_15, %c0_16] : memref<1x128xf32, #tpu.memory_space<vmem>>, vector<1x128xf32>
    %21 = vector.broadcast %20 : vector<1x128xf32> to vector<8x128xf32>
    %22 = arith.addf %19, %21 : vector<8x128xf32>
    %cst_17 = arith.constant dense<0xFF800000> : vector<8xf32>
    %23 = vector.multi_reduction <maximumf>, %22, %cst_17 [1] : vector<8x128xf32> to vector<8xf32>
    %24 = vector.shape_cast %23 : vector<8xf32> to vector<8x1xf32>
    %25 = vector.broadcast %24 : vector<8x1xf32> to vector<8x128xf32>
    %26 = arith.subf %22, %25 : vector<8x128xf32>
    %27 = math.exp %26 : vector<8x128xf32>
    %cst_18 = arith.constant dense<0.000000e+00> : vector<8xf32>
    %28 = vector.multi_reduction <add>, %27, %cst_18 [1] : vector<8x128xf32> to vector<8xf32>
    %29 = vector.shape_cast %28 : vector<8xf32> to vector<8x1xf32>
    %30 = vector.broadcast %29 : vector<8x1xf32> to vector<8x128xf32>
    %31 = arith.divf %27, %30 : vector<8x128xf32>
    %c0_19 = arith.constant 0 : index
    %c0_20 = arith.constant 0 : index
    %32 = vector.load %arg8[%c0_19, %c0_20] : memref<8x128xf32, #tpu.memory_space<vmem>>, vector<8x128xf32>
    tpu.vector_store %arg8[%c0_19, %c0_20], %31 {strides = array<i32>} : memref<8x128xf32, #tpu.memory_space<vmem>>, vector<8x128xf32>,
    return
  }
  func.func @transform_0(%arg0: i32) -> (i32, i32) {
    %c0_i32 = arith.constant 0 : i32
    %c0_i32_0 = arith.constant 0 : i32
    return %arg0, %c0_i32 : i32, i32
  }
  func.func @transform_1(%arg0: i32) -> (i32, i32) {
    %c0_i32 = arith.constant 0 : i32
    %c0_i32_0 = arith.constant 0 : i32
    %c0_i32_1 = arith.constant 0 : i32
    return %c0_i32, %c0_i32_0 : i32, i32
  }
  func.func @transform_2(%arg0: i32) -> (i32, i32) {
    %c0_i32 = arith.constant 0 : i32
    %c0_i32_0 = arith.constant 0 : i32
    %c0_i32_1 = arith.constant 0 : i32
    return %c0_i32, %c0_i32_0 : i32, i32
  }
  func.func @transform_3(%arg0: i32) -> (i32, i32) {
    %c0_i32 = arith.constant 0 : i32
    %c0_i32_0 = arith.constant 0 : i32
    %c0_i32_1 = arith.constant 0 : i32
    return %c0_i32, %c0_i32_0 : i32, i32
  }
  func.func @transform_4(%arg0: i32) -> (i32, i32) {
    %c0_i32 = arith.constant 0 : i32
    %c0_i32_0 = arith.constant 0 : i32
    %c0_i32_1 = arith.constant 0 : i32
    return %c0_i32, %c0_i32_0 : i32, i32
  }
  func.func @transform_5(%arg0: i32) -> (i32, i32) {
    %c0_i32 = arith.constant 0 : i32
    %c0_i32_0 = arith.constant 0 : i32
    %c0_i32_1 = arith.constant 0 : i32
    return %c0_i32, %c0_i32_0 : i32, i32
  }
  func.func @transform_6(%arg0: i32) -> (i32, i32) {
    %c0_i32 = arith.constant 0 : i32
    %c0_i32_0 = arith.constant 0 : i32
    %c0_i32_1 = arith.constant 0 : i32
    return %c0_i32, %c0_i32_0 : i32, i32
  }
  func.func @transform_7(%arg0: i32) -> (i32, i32) {
    %c0_i32 = arith.constant 0 : i32
    %c0_i32_0 = arith.constant 0 : i32
    return %arg0, %c0_i32 : i32, i32
  }
}

</mosaic_0001>

<bundles_post_ra>
// kernel: tpu_custom_call.1
= control target key start
LH: loop header
LB: loop body
LE: loop exit
PB: predicated region body
PF: predicated region fallthrough
CT: control target
= control target key end

     0   :  { %12 = vsyncpa [#allocation3], 0  ;;  %s1005_s0 = inlined_call_operand.hbm [shape: f32[8,16], index: 0, kind: input, shape index: {}]   ;;  %s1006_s1 = inlined_call_operand.hbm [shape: bf16[16,256], index: 1, kind: input, shape index: {}]   ;;  %s1007_s2 = inlined_call_operand.vmem [shape: f32[1,256], index: 2, kind: input, shape index: {}]   ;;  %s1008_s3 = inlined_call_operand.hbm [shape: bf16[256,256], index: 3, kind: input, shape index: {}]   ;;  %s1009_s4 = inlined_call_operand.vmem [shape: f32[1,256], index: 4, kind: input, shape index: {}]   ;;  %s1010_s5 = inlined_call_operand.hbm [shape: bf16[256,128], index: 5, kind: input, shape index: {}]   ;;  %s1011_s6 = inlined_call_operand.vmem [shape: f32[1,128], index: 6, kind: input, shape index: {}]   ;;  %s1012_s7 = inlined_call_operand.hbm [shape: f32[8,128], index: 7, kind: output, shape index: {}]  }
   0x1   :  { %13 = vsyncpa [#allocation6], 0 }
   0x2   :  { %14 = vsyncpa [#allocation9], 0 }
   0x3   :  { %15 = vsyncpa [#allocation4], 0  ;;  %s880_s24 = smov [#allocation5]   ;;  %s762_s28 = scalar_lea.hbm %s1006_s1, 256 }
   0x4   :  { %s31_s25 = sshll.u32 %s880_s24, 4  ;;  %p763_p0 = scmp.ne.s32.totalorder %s1006_s1, %s762_s28  ;;  %s32_s25 = int_to_ptr.vmem [resolvable:$true] %s31_s25 }
   0x5   :  { %p766_p1 = scmp.lt.u32.totalorder %s762_s28, %s1006_s1 }
   0x7   :  { %p768_p2 = pnand %p766_p1, %p763_p0 }
   0x9   :  { %771 = shalt.err (!%p768_p2)
}
   0xa   :  { %s772_s10 = scalar_lea.vmem %s32_s25, 256  ;;  %p777_p4 = scmp.lt.s32.totalorder %s32_s25, %s32_s25 }
   0xb   :  { %p773_p3 = scmp.ne.s32.totalorder %s32_s25, %s772_s10  ;;  %p778_p5 = scmp.lt.s32.totalorder %s772_s10, %s772_s10 }
   0xd   :  { %p779_p6 = por %p778_p5, %p777_p4 }
   0xf   :  { %p780_p7 = pnand %p779_p6, %p773_p3 }
  0x11   :  { %783 = shalt.err (!%p780_p7)
}
  0x12   :  { %s881_s11 = smov 128   ;;  %s882_s12 = smov 8  }
  0x13   :  { %37 = dma.hbm_to_vmem [thread:$0]  %s1006_s1, 256, %s32_s25, [#allocation6], %s881_s11, %s881_s11, %s882_s12  }
  0x14   :  { %s883_s15 = smov [#allocation2]   ;;  %s884_s17 = smov [#allocation7]  }
  0x15   :  { %s22_s16 = sshll.u32 %s883_s15, 4  ;;  %s45_s18 = sshll.u32 %s884_s17, 4  ;;  %s23_s16 = int_to_ptr.vmem [resolvable:$true] %s22_s16  ;;  %s46_s18 = int_to_ptr.vmem [resolvable:$true] %s45_s18 }
  0x16   :  { %s784_s21 = scalar_lea.hbm %s1005_s0, 128 }
  0x17   :  { %p785_p8 = scmp.ne.s32.totalorder %s1005_s0, %s784_s21  ;;  %p788_p9 = scmp.lt.u32.totalorder %s784_s21, %s1005_s0 }
  0x19   :  { %p790_p10 = pnand %p788_p9, %p785_p8 }
  0x1b   :  { %793 = shalt.err (!%p790_p10)
}
  0x1c   :  { %s794_s1 = scalar_lea.vmem %s23_s16, 128  ;;  %p799_p12 = scmp.lt.s32.totalorder %s23_s16, %s23_s16 }
  0x1d   :  { %p795_p11 = scmp.ne.s32.totalorder %s23_s16, %s794_s1  ;;  %p800_p13 = scmp.lt.s32.totalorder %s794_s1, %s794_s1 }
  0x1f   :  { %p801_p0 = por %p800_p13, %p799_p12 }
  0x21   :  { %p802_p1 = pnand %p801_p0, %p795_p11 }
  0x23   :  { %805 = shalt.err (!%p802_p1)
}
  0x24   :  { %25 = dma.hbm_to_vmem [thread:$0]  %s1005_s0, 128, %s23_s16, [#allocation3]  }
  0x25   :  { %s806_s30 = scalar_lea.hbm %s1008_s3, 4096 }
  0x26   :  { %p807_p2 = scmp.ne.s32.totalorder %s1008_s3, %s806_s30  ;;  %p810_p3 = scmp.lt.u32.totalorder %s806_s30, %s1008_s3 }
  0x28   :  { %p812_p4 = pnand %p810_p3, %p807_p2 }
  0x2a   :  { %815 = shalt.err (!%p812_p4)
}
  0x2b   :  { %s816_s14 = scalar_lea.vmem %s46_s18, 4096  ;;  %p821_p6 = scmp.lt.s32.totalorder %s46_s18, %s46_s18 }
  0x2c   :  { %p817_p5 = scmp.ne.s32.totalorder %s46_s18, %s816_s14  ;;  %p822_p7 = scmp.lt.s32.totalorder %s816_s14, %s816_s14 }
  0x2e   :  { %p823_p8 = por %p822_p7, %p821_p6 }
  0x30   :  { %p824_p9 = pnand %p823_p8, %p817_p5 }
  0x32   :  { %827 = shalt.err (!%p824_p9)
}
  0x33   :  { %51 = dma.hbm_to_vmem [thread:$0]  %s1008_s3, 4096, %s46_s18, [#allocation6], %s881_s11, %s881_s11, %s882_s12  }
  0x34   :  { %s885_s16 = smov [#allocation8]   ;;  %s828_s21 = scalar_lea.hbm %s1010_s5, 2048 }
  0x35   :  { %s59_s17 = sshll.u32 %s885_s16, 4  ;;  %p829_p10 = scmp.ne.s32.totalorder %s1010_s5, %s828_s21  ;;  %s60_s17 = int_to_ptr.vmem [resolvable:$true] %s59_s17 }
  0x36   :  { %p832_p11 = scmp.lt.u32.totalorder %s828_s21, %s1010_s5 }
  0x38   :  { %p834_p12 = pnand %p832_p11, %p829_p10 }
  0x3a   :  { %837 = shalt.err (!%p834_p12)
}
  0x3b   :  { %s838_s1 = scalar_lea.vmem %s60_s17, 2048  ;;  %p843_p0 = scmp.lt.s32.totalorder %s60_s17, %s60_s17 }
  0x3c   :  { %p839_p13 = scmp.ne.s32.totalorder %s60_s17, %s838_s1  ;;  %p844_p1 = scmp.lt.s32.totalorder %s838_s1, %s838_s1 }
  0x3e   :  { %p845_p2 = por %p844_p1, %p843_p0 }
  0x40   :  { %p846_p3 = pnand %p845_p2, %p839_p13 }
  0x42   :  { %849 = shalt.err (!%p846_p3)
}
  0x43   :  { %s886_s3 = smov 64   ;;  %s887_s11 = smov 4  }
  0x44   :  { %65 = dma.hbm_to_vmem [thread:$0]  %s1010_s5, 2048, %s60_s17, [#allocation9], %s886_s3, %s886_s3, %s887_s11  }
  0x45   :  { %872 = dma.done.wait [#allocation3], 128  }
  0x46   :  { %873 = vsyncadd [#allocation3], 4294967168 }
  0x47   :  { %874 = dma.done.wait [#allocation6], 4352  }
  0x48   :  { %875 = vsyncadd [#allocation6], 4294962944 }
  0x49   :  { %876 = dma.done.wait [#allocation9], 2048  }
  0x4a   :  { %877 = vsyncadd [#allocation9], 4294965248  ;;  %v888_v0 = vmov 0   ;;  %v691_v1 = vld [vmem:[#allocation5 + $0x4] ss:$8 sps:$4 sm:$0xff]   ;;  %v81_v3 = vld [vmem:[#allocation2] sm:$0xff]  ;;  %v87_v49 = vlaneseq }
  0x4b   :  { %143 = vmatprep.mubr.bf16.mxu0 %v888_v0  ;;  %v693_v2 = vld [vmem:[#allocation5] ss:$8 sps:$4 sm:$0xff]   ;;  %111 = vmatprep.subr.bf16.mxu0 %v691_v1  ;;  %v82_v4 = vpack.c.bf16 %v81_v3, %v81_v3  ;;  %v694_v5 = vld [vmem:[#allocation7 + $0x4] ss:$8 sps:$4 sm:$0xff]   ;;  %v696_v6 = vld [vmem:[#allocation7] ss:$8 sps:$4 sm:$0xff]  }
  0x4c   :  { %112 = vmatpush1.bf16.msra.mxu0 %v693_v2  ;;  %vm107_vm0 = vcmask 130048   ;;  %v697_v7 = vld [vmem:[#allocation7 + $0x14] ss:$8 sps:$4 sm:$0xff]   ;;  %360 = vmatprep.subr.bf16.mxu1 %v694_v5  ;;  %v699_v8 = vld [vmem:[#allocation7 + $0x10] ss:$8 sps:$4 sm:$0xff]   ;;  %v742_v37 = vld [vmem:[#allocation8 + $0x40] sm:$0xff]  }
  0x4d   :  { %361 = vmatpush1.bf16.msra.mxu1 %v696_v6  ;;  %v700_v9 = vld [vmem:[#allocation7 + $0x24] ss:$8 sps:$4 sm:$0xff]   ;;  %v702_v10 = vld [vmem:[#allocation7 + $0x20] ss:$8 sps:$4 sm:$0xff]   ;;  %v703_v11 = vld [vmem:[#allocation7 + $0x34] ss:$8 sps:$4 sm:$0xff]   ;;  %659 = vmatprep.subr.bf16.mxu0 %v742_v37 }
  0x4e   :  { %362 = vmatprep.subr.bf16.mxu1 %v697_v7  ;;  %v705_v12 = vld [vmem:[#allocation7 + $0x30] ss:$8 sps:$4 sm:$0xff]   ;;  %v706_v13 = vld [vmem:[#allocation7 + $0x44] ss:$8 sps:$4 sm:$0xff]   ;;  %v708_v14 = vld [vmem:[#allocation7 + $0x40] ss:$8 sps:$4 sm:$0xff]  }
  0x4f   :  { %609 = vmatmul.mubr.msk.bf16.vlgmr.msra.gmra.mrb[0].mxu0 %vm107_vm0, %v82_v4  ;;  %v709_v15 = vld [vmem:[#allocation7 + $0x54] ss:$8 sps:$4 sm:$0xff]   ;;  %v711_v16 = vld [vmem:[#allocation7 + $0x50] ss:$8 sps:$4 sm:$0xff]   ;;  %v712_v17 = vld [vmem:[#allocation7 + $0x64] ss:$8 sps:$4 sm:$0xff]  }
  0x50   :  { %v714_v18 = vld [vmem:[#allocation7 + $0x60] ss:$8 sps:$4 sm:$0xff]   ;;  %v715_v19 = vld [vmem:[#allocation7 + $0x74] ss:$8 sps:$4 sm:$0xff]   ;;  %v717_v20 = vld [vmem:[#allocation7 + $0x70] ss:$8 sps:$4 sm:$0xff]  }
  0x51   :  { %363 = vmatpush1.bf16.msra.mxu1 %v699_v8  ;;  %v718_v21 = vld [vmem:[#allocation7 + $0x84] ss:$8 sps:$4 sm:$0xff]   ;;  %v720_v22 = vld [vmem:[#allocation7 + $0x80] ss:$8 sps:$4 sm:$0xff]   ;;  %v721_v23 = vld [vmem:[#allocation7 + $0x94] ss:$8 sps:$4 sm:$0xff]  }
  0x52   :  { %364 = vmatprep.subr.bf16.mxu1 %v700_v9  ;;  %v723_v24 = vld [vmem:[#allocation7 + $0x90] ss:$8 sps:$4 sm:$0xff]   ;;  %v724_v25 = vld [vmem:[#allocation7 + $0xa4] ss:$8 sps:$4 sm:$0xff]   ;;  %v726_v26 = vld [vmem:[#allocation7 + $0xa0] ss:$8 sps:$4 sm:$0xff]  }
  0x53   :  { %v727_v27 = vld [vmem:[#allocation7 + $0xb4] ss:$8 sps:$4 sm:$0xff]   ;;  %v729_v28 = vld [vmem:[#allocation7 + $0xb0] ss:$8 sps:$4 sm:$0xff]   ;;  %v730_v29 = vld [vmem:[#allocation7 + $0xc4] ss:$8 sps:$4 sm:$0xff]  }
  0x54   :  { %v732_v30 = vld [vmem:[#allocation7 + $0xc0] ss:$8 sps:$4 sm:$0xff]   ;;  %v733_v31 = vld [vmem:[#allocation7 + $0xd4] ss:$8 sps:$4 sm:$0xff]   ;;  %v735_v32 = vld [vmem:[#allocation7 + $0xd0] ss:$8 sps:$4 sm:$0xff]  }
  0x55   :  { %365 = vmatpush1.bf16.msra.mxu1 %v702_v10  ;;  %v736_v33 = vld [vmem:[#allocation7 + $0xe4] ss:$8 sps:$4 sm:$0xff]   ;;  %v738_v34 = vld [vmem:[#allocation7 + $0xe0] ss:$8 sps:$4 sm:$0xff]   ;;  %v739_v35 = vld [vmem:[#allocation7 + $0xf4] ss:$8 sps:$4 sm:$0xff]  }
  0x56   :  { %366 = vmatprep.subr.bf16.mxu1 %v703_v11  ;;  %v741_v36 = vld [vmem:[#allocation7 + $0xf0] ss:$8 sps:$4 sm:$0xff]   ;;  %v743_v38 = vld [vmem:[#allocation8] sm:$0xff]   ;;  %v744_v39 = vld [vmem:[#allocation8 + $0x48] sm:$0xff]   ;;  %v88_v50 = vshrl.u32 %v87_v49, 7 }
  0x57   :  { %660 = vmatpush3.bf16.msra.mxu0 %v743_v38  ;;  %v745_v40 = vld [vmem:[#allocation8 + $0x8] sm:$0xff]   ;;  %v746_v41 = vld [vmem:[#allocation8 + $0x50] sm:$0xff]   ;;  %v748_v43 = vld [vmem:[#allocation8 + $0x58] sm:$0xff]  }
  0x58   :  { %661 = vmatprep.subr.bf16.mxu0 %v744_v39  ;;  %v747_v42 = vld [vmem:[#allocation8 + $0x10] sm:$0xff]   ;;  %v749_v44 = vld [vmem:[#allocation8 + $0x18] sm:$0xff]   ;;  %v750_v45 = vld [vmem:[#allocation8 + $0x60] sm:$0xff]   ;;  %v89_v51 = vsub.s32 0, %v88_v50  ;;  %v93_v53 = vsub.s32 1, %v88_v50 }
  0x59   :  { %367 = vmatpush1.bf16.msra.mxu1 %v705_v12  ;;  %v751_v46 = vld [vmem:[#allocation8 + $0x20] sm:$0xff]   ;;  %v752_v47 = vld [vmem:[#allocation8 + $0x68] sm:$0xff]   ;;  %v754_v2 = vld [vmem:[#allocation8 + $0x70] sm:$0xff]  }
  0x5a   :  { %368 = vmatprep.subr.bf16.mxu1 %v706_v13  ;;  %v753_v48 = vld [vmem:[#allocation8 + $0x28] sm:$0xff]   ;;  %v755_v3 = vld [vmem:[#allocation8 + $0x30] sm:$0xff]   ;;  %v756_v4 = vld [vmem:[#allocation8 + $0x78] sm:$0xff]  }
  0x5b   :  { %662 = vmatpush3.bf16.msra.mxu0 %v745_v40  ;;  %v85_v52 = vld [vmem:[%s1007_s2] sm:$0x3]  ;;  %v757_v5 = vld [vmem:[#allocation8 + $0x38] sm:$0xff]  }
  0x5c   :  { %663 = vmatprep.subr.bf16.mxu0 %v746_v41  ;;  %v90_v54 = vrot.slane %v85_v52, %v89_v51  ;;  %v94_v55 = vrot.slane %v85_v52, %v93_v53  ;;  %v188_v6 = vld [vmem:[%s1009_s4] sm:$0x3]  ;;  %s889_s4 = smov [#allocation10]  }
  0x5d   :  { %369 = vmatpush1.bf16.msra.mxu1 %v708_v14  ;;  %v193_v7 = vrot.slane %v188_v6, %v89_v51  ;;  %v197_v8 = vrot.slane %v188_v6, %v93_v53  ;;  %s596_s30 = sshll.u32 %s889_s4, 4  ;;  %s597_s30 = int_to_ptr.vmem [resolvable:$true] %s596_s30 }
  0x5e   :  { %370 = vmatprep.subr.bf16.mxu1 %v709_v15  ;;  %p855_p5 = scmp.lt.s32.totalorder %s597_s30, %s597_s30 }
  0x5f   :  { %664 = vmatpush3.bf16.msra.mxu0 %v747_v42 }
  0x60   :  { %665 = vmatprep.subr.bf16.mxu0 %v748_v43 }
  0x61   :  { %371 = vmatpush1.bf16.msra.mxu1 %v711_v16 }
  0x62   :  { %372 = vmatprep.subr.bf16.mxu1 %v712_v17 }
  0x63   :  { %666 = vmatpush3.bf16.msra.mxu0 %v749_v44 }
  0x64   :  { %667 = vmatprep.subr.bf16.mxu0 %v750_v45 }
  0x65   :  { %373 = vmatpush1.bf16.msra.mxu1 %v714_v18 }
  0x66   :  { %374 = vmatprep.subr.bf16.mxu1 %v715_v19 }
  0x67   :  { %668 = vmatpush3.bf16.msra.mxu0 %v751_v46 }
  0x68   :  { %669 = vmatprep.subr.bf16.mxu0 %v752_v47 }
  0x69   :  { %375 = vmatpush1.bf16.msra.mxu1 %v717_v20 }
  0x6a   :  { %376 = vmatprep.subr.bf16.mxu1 %v718_v21  ;;  %v642_v21 = vld [vmem:[%s1011_s6] ss:$0 sm:$0xff]  ;;  %s850_s6 = scalar_lea.vmem %s597_s30, 128 }
  0x6b   :  { %670 = vmatpush3.bf16.msra.mxu0 %v753_v48  ;;  %p851_p4 = scmp.ne.s32.totalorder %s597_s30, %s850_s6  ;;  %p856_p6 = scmp.lt.s32.totalorder %s850_s6, %s850_s6 }
  0x6c   :  { %671 = vmatprep.subr.bf16.mxu0 %v754_v2 }
  0x6d   :  { %377 = vmatpush1.bf16.msra.mxu1 %v720_v22  ;;  %p857_p7 = por %p856_p6, %p855_p5 }
  0x6e   :  { %378 = vmatprep.subr.bf16.mxu1 %v721_v23 }
  0x6f   :  { %672 = vmatpush3.bf16.msra.mxu0 %v755_v3  ;;  %p858_p8 = pnand %p857_p7, %p851_p4 }
  0x70   :  { %673 = vmatprep.subr.bf16.mxu0 %v756_v4 }
  0x71   :  { %379 = vmatpush1.bf16.msra.mxu1 %v723_v24 }
  0x72   :  { %380 = vmatprep.subr.bf16.mxu1 %v724_v25 }
  0x73   :  { %674 = vmatpush3.bf16.msra.mxu0 %v757_v5 }
  0x75   :  { %381 = vmatpush1.bf16.msra.mxu1 %v726_v26 }
  0x76   :  { %382 = vmatprep.subr.bf16.mxu1 %v727_v27 }
  0x79   :  { %383 = vmatpush1.bf16.msra.mxu1 %v729_v28 }
  0x7a   :  { %384 = vmatprep.subr.bf16.mxu1 %v730_v29 }
  0x7d   :  { %385 = vmatpush1.bf16.msra.mxu1 %v732_v30 }
  0x7e   :  { %386 = vmatprep.subr.bf16.mxu1 %v733_v31 }
  0x81   :  { %387 = vmatpush1.bf16.msra.mxu1 %v735_v32 }
  0x82   :  { %388 = vmatprep.subr.bf16.mxu1 %v736_v33 }
  0x85   :  { %389 = vmatpush1.bf16.msra.mxu1 %v738_v34 }
  0x86   :  { %390 = vmatprep.subr.bf16.mxu1 %v739_v35 }
  0x89   :  { %391 = vmatpush1.bf16.msra.mxu1 %v741_v36 }
 0x122   :  { %v145_v56 = vpop.f32.mrb[0].mxu0 }
 0x123   :  { %v146_v57 = vadd.f32 %v145_v56, %v90_v54  ;;  %v147_v58 = vpop.f32.mrb[1].mxu0 }
 0x124   :  { %v148_v59 = vadd.f32 %v147_v58, %v94_v55  ;;  %v149_v60 = vpop.f32.mrb[2].mxu0 }
 0x125   :  { %v152_v61 = vmax.f32 %v146_v57, 0.0  ;;  %v150_v62 = vpop.f32.mrb[3].mxu0 }
 0x126   :  { %v153_v63 = vmax.f32 %v148_v59, 0.0 }
 0x127   :  { %v154_v1 = vpack.c.bf16 %v152_v61, %v152_v61 }
 0x128   :  { %v155_v0 = vpack.c.bf16 %v153_v63, %v153_v63 }
 0x12a   :  { %392 = vmatprep.mubr.bf16.mxu1 %v155_v0 }
 0x12b   :  { %393 = vmatmul.mubr.bf16.vlgmr.msra.gmra.mrb[0].mxu1 %v154_v1 }
 0x1fe   :  { %v394_v9 = vpop.f32.mrb[0].mxu1 }
 0x1ff   :  { %v395_v10 = vadd.f32 %v394_v9, %v193_v7  ;;  %v396_v11 = vpop.f32.mrb[1].mxu1 }
 0x200   :  { %v397_v12 = vadd.f32 %v396_v11, %v197_v8  ;;  %v398_v13 = vpop.f32.mrb[2].mxu1 }
 0x201   :  { %v401_v14 = vmax.f32 %v395_v10, 0.0  ;;  %v399_v15 = vpop.f32.mrb[3].mxu1 }
 0x202   :  { %v402_v16 = vmax.f32 %v397_v12, 0.0 }
 0x203   :  { %v403_v18 = vpack.c.bf16 %v401_v14, %v401_v14 }
 0x204   :  { %v404_v17 = vpack.c.bf16 %v402_v16, %v402_v16 }
 0x206   :  { %572 = vmatprep.mubr.bf16.mxu0 %v404_v17 }
 0x207   :  { %573 = vmatmul.mubr.bf16.vlgmr.msra.gmra.mrb[4].mxu0 %v403_v18 }
 0x2da   :  { %v675_v19 = vpop.f32.mrb[4].mxu0 }
 0x2db   :  { %v676_v20 = vpop.f32.mrb[5].mxu0 }
 0x2dc   :  { %v677_v22 = vadd.f32 %v676_v20, %v675_v19  ;;  %v678_v23 = vpop.f32.mrb[6].mxu0 }
 0x2dd   :  { %v679_v24 = vpop.f32.mrb[7].mxu0 }
 0x2de   :  { %v575_v25 = vadd.f32 %v677_v22, %v642_v21 }
 0x2e0   :  { %580 = vmax.xlane.f32.xlu0 %v575_v25 }
 0x36d   :  { %v581_v26 = vpop.xlane.xlu0 %580 }
 0x36e   :  { %v582_v27 = vsub.f32 %v575_v25, %v581_v26 }
 0x370   :  { %v583_v28 = vmul.f32 1.442695, %v582_v27 }
 0x372   :  { %758 = vpow2.f32 %v583_v28 }
 0x37c   :  { %v759_v29 = vpop.eup %758 }
 0x37d   :  { %585 = vadd.xlane.f32.xlu0 %v759_v29 }
 0x40a   :  { %v586_v30 = vpop.xlane.xlu0 %585 }
 0x40b   :  { %760 = vrcp.f32 %v586_v30 }
 0x415   :  { %v761_v31 = vpop.eup %760 }
 0x416   :  { %v588_v32 = vmul.f32 %v761_v31, %v759_v29 }
 0x418   :  { %589 = vst [vmem:[#allocation10] sm:$0xff] %v588_v32 }
 0x419   :  { %861 = shalt.err (!%p858_p8)
}
 0x41a   :  { %s862_s10 = scalar_lea.hbm %s1012_s7, 128 }
 0x41b   :  { %p863_p9 = scmp.ne.s32.totalorder %s1012_s7, %s862_s10  ;;  %p866_p10 = scmp.lt.u32.totalorder %s862_s10, %s1012_s7 }
 0x41d   :  { %p868_p11 = pnand %p866_p10, %p863_p9 }
 0x41f   :  { %871 = shalt.err (!%p868_p11)
}
 0x420   :  { %599 = dma.vmem_to_hbm [thread:$0]  %s597_s30, 128, %s1012_s7, [#allocation4]  }
 0x421   :  { %878 = dma.done.wait [#allocation4], 128  }
 0x422   :  { %879 = vsyncadd [#allocation4], 4294967168 }
 0x423   :  { %603 = vsyncpa [#allocation3], 1 }
 0x424   :  { %604 = vsyncpa [#allocation6], 1 }
 0x425   :  { %605 = vsyncpa [#allocation9], 1 }
 0x426   :  { %606 = vsyncpa [#allocation4], 1 }

</bundles_post_ra>
